<compile_context>
chip_gen: v6e
topology: v6e:2x2x1
jax: 0.10.0
libtpu: 0.0.40
codegen_flags: <defaults>
</compile_context>

<pallas_src>
import functools

import jax
import jax.numpy as jnp
from jax.experimental import pallas as pl
from jax.experimental.pallas import tpu as pltpu


def _round_up(n: int, m: int) -> int:
    return ((n + m - 1) // m) * m


# ---------------------------------------------------------------------------
# Parameter init / packing
# ---------------------------------------------------------------------------

def init_actor_params(key, observation_size, layer_1_size, layer_2_size, action_dim):
    """Deterministic synthetic init (PyTorch-Linear-style uniform bounds).

    Weights are stored as [in_features, out_features] (transposed vs nn.Linear),
    biases as [1, out_features].
    """
    def linear(key, fan_in, fan_out):
        kw, kb = jax.random.split(key)
        bound = 1.0 / jnp.sqrt(float(fan_in))
        w = jax.random.uniform(kw, (fan_in, fan_out), jnp.float32, -bound, bound)
        b = jax.random.uniform(kb, (1, fan_out), jnp.float32, -bound, bound)
        return w, b

    k1, k2, k3, k4 = jax.random.split(key, 4)
    w1, b1 = linear(k1, observation_size, layer_1_size)
    w2, b2 = linear(k2, layer_1_size, layer_2_size)
    wm, bm = linear(k3, layer_2_size, action_dim)
    ws, bs = linear(k4, layer_2_size, action_dim)
    return {"w1": w1, "b1": b1, "w2": w2, "b2": b2,
            "wm": wm, "bm": bm, "ws": ws, "bs": bs}


def pack_actor_params(params):
    """Pack all weights/biases into one contiguous f32 buffer (done once, offline).

    Layout (row offsets aligned to 8 sublanes; lane dim padded to >=128 so every
    in-kernel slice is a full-lane load):
      rows [0          : obs      ) cols [0 : L1 )  -> W1
      rows [r1         : r1 + L1  ) cols [0 : L2 )  -> W2
      rows [r2         : r2 + L2  ) cols [0 : 2A )  -> [Wm | Ws]  (fused heads)
      row   rb                      cols [0 : L1 )  -> b1
      row   rb + 1                  cols [0 : L2 )  -> b2
      row   rb + 2                  cols [0 : 2A )  -> [bm | bs]
    """
    w1, b1 = params["w1"], params["b1"]
    w2, b2 = params["w2"], params["b2"]
    wm, bm = params["wm"], params["bm"]
    ws, bs = params["ws"], params["bs"]

    obs, L1 = w1.shape
    _, L2 = w2.shape
    A = wm.shape[1]
    two_a = 2 * A

    wh = jnp.concatenate([wm, ws], axis=1)   # [L2, 2A]
    bh = jnp.concatenate([bm, bs], axis=1)   # [1, 2A]

    r1 = _round_up(obs, 8)
    r2 = r1 + _round_up(L1, 8)
    rb = r2 + _round_up(L2, 8)
    nrows = rb + 8
    ncols = max(L1, L2, two_a, 128)          # lane-pad to 128: full-lane vlds in-kernel

    buf = jnp.zeros((nrows, ncols), jnp.float32)
    buf = buf.at[0:obs, 0:L1].set(w1)
    buf = buf.at[r1:r1 + L1, 0:L2].set(w2)
    buf = buf.at[r2:r2 + L2, 0:two_a].set(wh)
    buf = buf.at[rb:rb + 1, 0:L1].set(b1)
    buf = buf.at[rb + 1:rb + 2, 0:L2].set(b2)
    buf = buf.at[rb + 2:rb + 3, 0:two_a].set(bh)

    layout = dict(obs=obs, L1=L1, L2=L2, A=A, r1=r1, r2=r2, rb=rb)
    return buf, layout


# ---------------------------------------------------------------------------
# Tiling choice
# ---------------------------------------------------------------------------

def _choose_batch_tile(B, obs, two_a, *, target_tile_bytes=2 << 20, max_tile=8192,
                       min_grid=2):
    """Pick a batch tile TB (multiple of 8).

    Sized so each tile carries ~target_tile_bytes of activation traffic (so per-step
    overhead is negligible), capped so the grid has >= min_grid steps whenever B
    permits (lets v7x shard the 'parallel' axis across both TensorCores), and capped
    at max_tile to bound VMEM.
    """
    row_bytes = (obs + two_a) * 4
    tb = _round_up(max(1, target_tile_bytes // row_bytes), 8)
    tb = min(tb, max_tile)
    if B >= min_grid * 8:
        # keep at least `min_grid` grid steps
        tb = min(tb, _round_up(pl.cdiv(B, min_grid), 8))
    tb = min(tb, _round_up(B, 8))
    return max(tb, 8)


# ---------------------------------------------------------------------------
# Kernel
# ---------------------------------------------------------------------------

def _make_actor_kernel(*, obs, L1, L2, A, r1, r2, rb):
    two_a = 2 * A

    def kernel(x_ref, p_ref, out_ref):
        x = x_ref[...]                                   # [TB, obs]

        # Static slices into the packed parameter buffer (no runtime cost).
        w1 = p_ref[0:obs, 0:L1]
        w2 = p_ref[r1:r1 + L1, 0:L2]
        wh = p_ref[r2:r2 + L2, 0:two_a]
        b1 = p_ref[rb:rb + 1, 0:L1]
        b2 = p_ref[rb + 1:rb + 2, 0:L2]
        bh = p_ref[rb + 2:rb + 3, 0:two_a]

        # fc1 + relu, fc2 + relu
        h1 = jnp.maximum(jnp.dot(x, w1, preferred_element_type=jnp.float32) + b1, 0.0)
        h2 = jnp.maximum(jnp.dot(h1, w2, preferred_element_type=jnp.float32) + b2, 0.0)

        # Fused heads: one matmul gives [mean | pre-tanh log_std] in one slab.
        heads = jnp.dot(h2, wh, preferred_element_type=jnp.float32) + bh   # [TB, 2A]

        # log_std = -5 + 0.5*(2-(-5))*(tanh(v)+1) == 3.5*tanh(v) - 1.5
        # (tanh of the mean half is free EUP filler; discarded by the select below.)
        log_std = 3.5 * jnp.tanh(heads) - 1.5
        col = jax.lax.broadcasted_iota(jnp.int32, heads.shape, 1)
        out_ref[...] = jnp.where(col >= A, log_std, heads).astype(out_ref.dtype)

    return kernel


# ---------------------------------------------------------------------------
# Wrapper
# ---------------------------------------------------------------------------

def actor_forward(x, packed_params, layout, *, max_batch_tile=8192,
                  target_tile_bytes=2 << 20, return_slab=False):
    """x: [B, obs] float32.

    Returns (mean, log_std), each [B, action_dim] float32 (module semantics).
    With return_slab=True, returns the single [B, 2*action_dim] slab
    ([:, :A] = mean, [:, A:] = log_std) so fused consumers avoid two extra
    column-slice copies in HBM.
    """
    B, obs = x.shape
    assert obs == layout["obs"]
    L1, L2, A = layout["L1"], layout["L2"], layout["A"]
    two_a = 2 * A
    p_rows, p_cols = packed_params.shape

    TB = _choose_batch_tile(B, obs, two_a,
                            target_tile_bytes=target_tile_bytes,
                            max_tile=max_batch_tile)
    B_pad = _round_up(B, TB)
    if B_pad != B:
        x = jnp.pad(x, ((0, B_pad - B), (0, 0)))
    grid = (B_pad // TB,)

    kernel = _make_actor_kernel(**layout)

    # Advisory cost hint for XLA's scheduler around this tiny custom call.
    flops = 2 * B_pad * (obs * L1 + L1 * L2 + L2 * two_a)
    cost = pl.CostEstimate(
        flops=flops,
        transcendentals=B_pad * two_a,
        bytes_accessed=B_pad * (obs + two_a) * 4 + p_rows * p_cols * 4,
    )

    out = pl.pallas_call(
        kernel,
        out_shape=jax.ShapeDtypeStruct((B_pad, two_a), jnp.float32),
        grid=grid,
        in_specs=[
            pl.BlockSpec((TB, obs), lambda i: (i, 0)),          # batch-tiled activations
            pl.BlockSpec((p_rows, p_cols), lambda i: (0, 0)),   # params stay VMEM-resident
        ],
        out_specs=pl.BlockSpec((TB, two_a), lambda i: (i, 0)),  # single output slab
        compiler_params=pltpu.CompilerParams(
            dimension_semantics=("parallel",),
            vmem_limit_bytes=32 * 1024 * 1024,                  # safe on v5e/v6e/v7x
        ),
        cost_estimate=cost,
    )(x, packed_params)

    if return_slab:
        return out[:B] if B_pad != B else out
    return out[:B, :A], out[:B, A:]


# ---------------------------------------------------------------------------
# Pure-JAX reference
# ---------------------------------------------------------------------------

def actor_forward_ref(x, p):
    h1 = jax.nn.relu(x @ p["w1"] + p["b1"])
    h2 = jax.nn.relu(h1 @ p["w2"] + p["b2"])
    mean = h2 @ p["wm"] + p["bm"]
    ls = jnp.tanh(h2 @ p["ws"] + p["bs"])
    log_std = -5.0 + 0.5 * (2.0 - (-5.0)) * (ls + 1.0)
    return mean, log_std


if __name__ == "__main__":
    # Small shapes consistent with the module: observation_size=16,
    # layer_1_size=32, layer_2_size=32, action_dim=8 (np.prod(action_space.shape)).
    observation_size = 16
    layer_1_size = 32
    layer_2_size = 32
    action_dim = 8

    key = jax.random.PRNGKey(0)
    k_params, k_x1, k_x2 = jax.random.split(key, 3)
    params = init_actor_params(k_params, observation_size, layer_1_size,
                               layer_2_size, action_dim)
    packed, layout = pack_actor_params(params)   # done once, offline

    # Case 1: small batch (single-tile grid).
    batch = 8
    x = jax.random.normal(k_x1, (batch, observation_size), jnp.float32)
    mean, log_std = actor_forward(x, packed, layout)
    jax.block_until_ready((mean, log_std))
    mean_ref, log_std_ref = actor_forward_ref(x, params)
    assert mean.shape == (batch, action_dim)
    assert log_std.shape == (batch, action_dim)
    assert jnp.allclose(mean, mean_ref, atol=1e-5, rtol=1e-5)
    assert jnp.allclose(log_std, log_std_ref, atol=1e-5, rtol=1e-5)
    assert bool(jnp.all(log_std >= -5.0)) and bool(jnp.all(log_std <= 2.0))

    # Case 2: awkward batch size -> exercises padding + multi-step parallel grid.
    batch2 = 1000
    x2 = jax.random.normal(k_x2, (batch2, observation_size), jnp.float32)
    mean2, log_std2 = actor_forward(x2, packed, layout)
    jax.block_until_ready((mean2, log_std2))
    mean2_ref, log_std2_ref = actor_forward_ref(x2, params)
    assert mean2.shape == (batch2, action_dim)
    assert jnp.allclose(mean2, mean2_ref, atol=1e-5, rtol=1e-5)
    assert jnp.allclose(log_std2, log_std2_ref, atol=1e-5, rtol=1e-5)

    # Slab path (no wrapper-side column slices) matches too.
    slab = actor_forward(x2, packed, layout, return_slab=True)
    jax.block_until_ready(slab)
    assert jnp.allclose(slab[:, :action_dim], mean2_ref, atol=1e-5, rtol=1e-5)
    assert jnp.allclose(slab[:, action_dim:], log_std2_ref, atol=1e-5, rtol=1e-5)

    print("KERNEL_OK")
</pallas_src>

<mosaic_0001>
module attributes {stable_mosaic.version = 11 : i64} {
  func.func @kernel(%arg0: i32, %arg1: memref<8x16xf32, #tpu.memory_space<vmem>>, %arg2: memref<88x128xf32, #tpu.memory_space<vmem>>, %arg3: memref<8x16xf32, #tpu.memory_space<vmem>>) attributes {dimension_semantics = [#tpu.dimension_semantics<parallel>], iteration_bounds = array<i64: 1>, scalar_prefetch = 0 : i64, scratch_operands = 0 : i64, tpu.core_type = #tpu.core_type<tc>, window_params = [{transform_indices = @transform_0, window_bounds = array<i64: 8, 16>}, {pipeline_mode = #tpu.pipeline_mode<synchronous>, transform_indices = @transform_1, window_bounds = array<i64: 88, 128>}, {transform_indices = @transform_2, window_bounds = array<i64: 8, 16>}]} {
    %c0 = arith.constant 0 : index
    %c0_0 = arith.constant 0 : index
    %0 = vector.load %arg1[%c0, %c0_0] : memref<8x16xf32, #tpu.memory_space<vmem>>, vector<8x16xf32>
    %c0_1 = arith.constant 0 : index
    %c0_2 = arith.constant 0 : index
    %1 = vector.load %arg2[%c0_1, %c0_2] : memref<88x128xf32, #tpu.memory_space<vmem>>, vector<16x32xf32>
    %c16 = arith.constant 16 : index
    %c0_3 = arith.constant 0 : index
    %2 = vector.load %arg2[%c16, %c0_3] : memref<88x128xf32, #tpu.memory_space<vmem>>, vector<32x32xf32>
    %c48 = arith.constant 48 : index
    %c0_4 = arith.constant 0 : index
    %3 = vector.load %arg2[%c48, %c0_4] : memref<88x128xf32, #tpu.memory_space<vmem>>, vector<32x16xf32>
    %c80 = arith.constant 80 : index
    %c0_5 = arith.constant 0 : index
    %4 = vector.load %arg2[%c80, %c0_5] : memref<88x128xf32, #tpu.memory_space<vmem>>, vector<1x32xf32>
    %c81 = arith.constant 81 : index
    %c0_6 = arith.constant 0 : index
    %5 = vector.load %arg2[%c81, %c0_6] : memref<88x128xf32, #tpu.memory_space<vmem>>, vector<1x32xf32>
    %c82 = arith.constant 82 : index
    %c0_7 = arith.constant 0 : index
    %6 = vector.load %arg2[%c82, %c0_7] : memref<88x128xf32, #tpu.memory_space<vmem>>, vector<1x16xf32>
    %cst = arith.constant dense<0.000000e+00> : vector<8x32xf32>
    %7 = tpu.matmul %0, %1, %cst {dimension_numbers = #tpu.dot_dimension_numbers<[1], [0], [0], [1], [0, 0, 1, 1], [], []>} : vector<8x16xf32>, vector<16x32xf32>, vector<8x32xf32> -> vector<8x32xf32>
    %8 = vector.broadcast %4 : vector<1x32xf32> to vector<8x32xf32>
    %9 = arith.addf %7, %8 : vector<8x32xf32>
    %cst_8 = arith.constant 0.000000e+00 : f32
    %10 = vector.broadcast %cst_8 : f32 to vector<8x32xf32>
    %11 = arith.maximumf %9, %10 : vector<8x32xf32>
    %cst_9 = arith.constant dense<0.000000e+00> : vector<8x32xf32>
    %12 = tpu.matmul %11, %2, %cst_9 {dimension_numbers = #tpu.dot_dimension_numbers<[1], [0], [0], [1], [0, 0, 1, 1], [], []>} : vector<8x32xf32>, vector<32x32xf32>, vector<8x32xf32> -> vector<8x32xf32>
    %13 = vector.broadcast %5 : vector<1x32xf32> to vector<8x32xf32>
    %14 = arith.addf %12, %13 : vector<8x32xf32>
    %cst_10 = arith.constant 0.000000e+00 : f32
    %15 = vector.broadcast %cst_10 : f32 to vector<8x32xf32>
    %16 = arith.maximumf %14, %15 : vector<8x32xf32>
    %cst_11 = arith.constant dense<0.000000e+00> : vector<8x16xf32>
    %17 = tpu.matmul %16, %3, %cst_11 {dimension_numbers = #tpu.dot_dimension_numbers<[1], [0], [0], [1], [0, 0, 1, 1], [], []>} : vector<8x32xf32>, vector<32x16xf32>, vector<8x16xf32> -> vector<8x16xf32>
    %18 = vector.broadcast %6 : vector<1x16xf32> to vector<8x16xf32>
    %19 = arith.addf %17, %18 : vector<8x16xf32>
    %20 = math.tanh %19 : vector<8x16xf32>
    %cst_12 = arith.constant 3.500000e+00 : f32
    %21 = vector.broadcast %cst_12 : f32 to vector<8x16xf32>
    %22 = arith.mulf %21, %20 : vector<8x16xf32>
    %cst_13 = arith.constant 1.500000e+00 : f32
    %23 = vector.broadcast %cst_13 : f32 to vector<8x16xf32>
    %24 = arith.subf %22, %23 : vector<8x16xf32>
    %25 = tpu.iota {dimensions = array<i32: 1>} : vector<8x16xi32>
    %c8_i32 = arith.constant 8 : i32
    %26 = vector.broadcast %c8_i32 : i32 to vector<8x16xi32>
    %27 = arith.cmpi sge, %25, %26 : vector<8x16xi32>
    %28 = arith.select %27, %24, %19 : vector<8x16xi1>, vector<8x16xf32>
    %c0_14 = arith.constant 0 : index
    %c0_15 = arith.constant 0 : index
    %29 = vector.load %arg3[%c0_14, %c0_15] : memref<8x16xf32, #tpu.memory_space<vmem>>, vector<8x16xf32>
    tpu.vector_store %arg3[%c0_14, %c0_15], %28 {strides = array<i32>} : memref<8x16xf32, #tpu.memory_space<vmem>>, vector<8x16xf32>,
    return
  }
  func.func @transform_0(%arg0: i32) -> (i32, i32) {
    %c0_i32 = arith.constant 0 : i32
    %c0_i32_0 = arith.constant 0 : i32
    return %arg0, %c0_i32 : i32, i32
  }
  func.func @transform_1(%arg0: i32) -> (i32, i32) {
    %c0_i32 = arith.constant 0 : i32
    %c0_i32_0 = arith.constant 0 : i32
    %c0_i32_1 = arith.constant 0 : i32
    return %c0_i32, %c0_i32_0 : i32, i32
  }
  func.func @transform_2(%arg0: i32) -> (i32, i32) {
    %c0_i32 = arith.constant 0 : i32
    %c0_i32_0 = arith.constant 0 : i32
    return %arg0, %c0_i32 : i32, i32
  }
}

</mosaic_0001>

<bundles_post_ra>
// kernel: tpu_custom_call.1
= control target key start
LH: loop header
LB: loop body
LE: loop exit
PB: predicated region body
PF: predicated region fallthrough
CT: control target
= control target key end

     0   :  { %7 = vsyncpa [#allocation3], 0  ;;  %s473_s0 = inlined_call_operand.hbm [shape: f32[8,16], index: 0, kind: input, shape index: {}]   ;;  %s474_s1 = inlined_call_operand.hbm [shape: f32[88,128], index: 1, kind: input, shape index: {}]   ;;  %s475_s2 = inlined_call_operand.hbm [shape: f32[8,16], index: 2, kind: output, shape index: {}]  }
   0x1   :  { %8 = vsyncpa [#allocation6], 0 }
   0x2   :  { %9 = vsyncpa [#allocation4], 0  ;;  %s435_s9 = smov [#allocation2]   ;;  %s436_s11 = smov [#allocation5]  }
   0x3   :  { %s16_s10 = sshll.u32 %s435_s9, 4  ;;  %s25_s12 = sshll.u32 %s436_s11, 4  ;;  %s17_s10 = int_to_ptr.vmem [resolvable:$true] %s16_s10  ;;  %s26_s12 = int_to_ptr.vmem [resolvable:$true] %s25_s12 }
   0x4   :  { %s377_s13 = scalar_lea.vmem %s17_s10, 128  ;;  %p382_p1 = scmp.lt.s32.totalorder %s17_s10, %s17_s10 }
   0x5   :  { %p378_p0 = scmp.ne.s32.totalorder %s17_s10, %s377_s13  ;;  %p383_p2 = scmp.lt.s32.totalorder %s377_s13, %s377_s13 }
   0x7   :  { %p384_p3 = por %p383_p2, %p382_p1 }
   0x9   :  { %p385_p4 = pnand %p384_p3, %p378_p0 }
   0xb   :  { %388 = shalt.err (!%p385_p4)
}
   0xc   :  { %19 = dma.hbm_to_vmem [thread:$0]  %s473_s0, 128, %s17_s10, [#allocation3]  }
   0xd   :  { %s397_s16 = scalar_lea.vmem %s26_s12, 1408  ;;  %p402_p6 = scmp.lt.s32.totalorder %s26_s12, %s26_s12 }
   0xe   :  { %p398_p5 = scmp.ne.s32.totalorder %s26_s12, %s397_s16  ;;  %p403_p7 = scmp.lt.s32.totalorder %s397_s16, %s397_s16 }
  0x10   :  { %p404_p8 = por %p403_p7, %p402_p6 }
  0x12   :  { %p405_p9 = pnand %p404_p8, %p398_p5 }
  0x14   :  { %408 = shalt.err (!%p405_p9)
}
  0x15   :  { %s437_s17 = smov 128   ;;  %s438_s18 = smov 8  }
  0x16   :  { %31 = dma.hbm_to_vmem [thread:$0]  %s474_s1, 1408, %s26_s12, [#allocation6], %s437_s17, %s437_s17, %s438_s18  }
  0x17   :  { %429 = dma.done.wait [#allocation3], 128  }
  0x18   :  { %430 = vsyncadd [#allocation3], 4294967168 }
  0x19   :  { %431 = dma.done.wait [#allocation6], 1408  }
  0x1a   :  { %432 = vsyncadd [#allocation6], 4294965888  ;;  %v439_v0 = vmov 0.0   ;;  %vm440_vm0 = vmmov 0   ;;  %v40_v1 = vld [vmem:[#allocation5 + $0x8] sm:$0xff]  ;;  %v39_v2 = vld [vmem:[#allocation5] sm:$0xff]  ;;  %v290_v26 = vlaneseq }
  0x1b   :  { %331 = vmatprep.subr.mxu0 %v439_v0  ;;  %335 = vmatprep.mubr.msk.f32.mxu0 %vm440_vm0, %v439_v0  ;;  %v38_v3 = vld [vmem:[#allocation2] sm:$0xff]  ;;  %vm56_vm1 = vcmask 130048   ;;  %v44_v4 = vld [vmem:[#allocation5 + $0x28] sm:$0xff]  ;;  %v43_v5 = vld [vmem:[#allocation5 + $0x20] sm:$0xff]  ;;  %vm135_vm2 = vcmask 261120   ;;  %s441_s0 = smov [#allocation7]  }
  0x1c   :  { %338 = vmatprep.subr.mxu1 %v439_v0  ;;  %346 = vmatprep.mubr.msk.f32.mxu1 %vm440_vm0, %v439_v0  ;;  %v42_v6 = vld [vmem:[#allocation5 + $0x18] sm:$0xff]  ;;  %v41_v7 = vld [vmem:[#allocation5 + $0x10] sm:$0xff]  ;;  %v48_v8 = vld [vmem:[#allocation5 + $0x48] sm:$0xff]  ;;  %v291_v27 = vand.u32 127, %v290_v26  ;;  %s301_s1 = sshll.u32 %s441_s0, 4  ;;  %s302_s1 = int_to_ptr.vmem [resolvable:$true] %s301_s1 }
  0x1d   :  { %332 = vmatpush3.msra.mxu0 %v40_v1  ;;  %339 = vmatpush3.msra.mxu1 %v44_v4  ;;  %v311_v9 = vld [vmem:[#allocation5 + $0x50] ss:$0 sm:$0xff]  ;;  %v47_v14 = vld [vmem:[#allocation5 + $0x40] sm:$0xff]  ;;  %v46_v15 = vld [vmem:[#allocation5 + $0x38] sm:$0xff]  ;;  %s409_s21 = scalar_lea.vmem %s302_s1, 128  ;;  %p414_p11 = scmp.lt.s32.totalorder %s302_s1, %s302_s1 }
  0x1e   :  { %333 = vmatprep.subr.mxu0 %v439_v0  ;;  %340 = vmatprep.subr.mxu1 %v439_v0  ;;  %v45_v16 = vld [vmem:[#allocation5 + $0x30] sm:$0xff]  ;;  %vm292_vm3 = vcmp.ge.s32.totalorder %v291_v27, 8  ;;  %p410_p10 = scmp.ne.s32.totalorder %s302_s1, %s409_s21  ;;  %p415_p12 = scmp.lt.s32.totalorder %s409_s21, %s409_s21 }
  0x1f   :  { %334 = vmatpush3.msra.mxu0 %v39_v2  ;;  %341 = vmatpush3.msra.mxu1 %v43_v5  ;;  %v313_v17 = vld [vmem:[#allocation5 + $0x51] ss:$0 sm:$0xff]  ;;  %v315_v22 = vld [vmem:[#allocation5 + $0x52] ss:$0 sm:$0xff] }
  0x20   :  { %336 = vmatmul.mubr.msk.f32.vlgmr.msra.gmra.mxu0 %vm56_vm1, %v38_v3  ;;  %349 = vmatprep.subr.mxu0 %v439_v0  ;;  %p416_p13 = por %p415_p12, %p414_p11 }
  0x21   :  { %357 = vmatprep.mubr.msk.f32.mxu0 %vm440_vm0, %v439_v0  ;;  %342 = vmatprep.subr.mxu1 %v439_v0 }
  0x22   :  { %343 = vmatpush3.msra.mxu1 %v42_v6  ;;  %350 = vmatpush3.msra.mxu0 %v48_v8  ;;  %p417_p0 = pnand %p416_p13, %p410_p10 }
  0x23   :  { %344 = vmatprep.subr.mxu1 %v439_v0  ;;  %351 = vmatprep.subr.mxu0 %v439_v0 }
  0x24   :  { %345 = vmatpush3.msra.mxu1 %v41_v7  ;;  %352 = vmatpush3.msra.mxu0 %v47_v14 }
  0x25   :  { %353 = vmatprep.subr.mxu0 %v439_v0 }
  0x26   :  { %354 = vmatpush3.msra.mxu0 %v46_v15 }
  0x27   :  { %355 = vmatprep.subr.mxu0 %v439_v0 }
  0x28   :  { %356 = vmatpush3.msra.mxu0 %v45_v16 }
  0xe0   :  { %v126_v10 = vpop.f32.mrf.mxu0 }
  0xe1   :  { %v127_v11 = vadd.f32 %v311_v9, %v126_v10 }
  0xe2   :  { %v337_v12 = vpop.f32.mrf.mxu0 }
  0xe3   :  { %v130_v13 = vmax.f32 %v127_v11, 0.0 }
  0xe5   :  { %347 = vmatmul.mubr.msk.f32.vlgmr.msra.gmra.mxu1 %vm135_vm2, %v130_v13 }
 0x1a5   :  { %v205_v18 = vpop.f32.mrf.mxu1 }
 0x1a6   :  { %v206_v19 = vadd.f32 %v313_v17, %v205_v18 }
 0x1a7   :  { %v348_v20 = vpop.f32.mrf.mxu1 }
 0x1a8   :  { %v209_v21 = vmax.f32 %v206_v19, 0.0 }
 0x1aa   :  { %358 = vmatmul.mubr.msk.f32.vlgmr.msra.gmra.mxu0 %vm135_vm2, %v209_v21 }
 0x26a   :  { %v283_v23 = vpop.f32.mrf.mxu0 }
 0x26b   :  { %v284_v24 = vadd.f32 %v315_v22, %v283_v23 }
 0x26c   :  { %v359_v25 = vpop.f32.mrf.mxu0 }
 0x26d   :  { %367 = vtanh.f32 %v284_v24 }
 0x27a   :  { %v368_v28 = vpop.eup %367 }
 0x27b   :  { %v288_v29 = vmul.f32 3.5, %v368_v28 }
 0x27d   :  { %v317_v30 = vadd.f32 -1.5, %v288_v29 }
 0x27f   :  { %v293_v31 = vsel %vm292_vm3, %v317_v30, %v284_v24 }
 0x280   :  { %294 = vst.msk [vmem:[#allocation7] sm:$0xff] %vm56_vm1, %v293_v31 }
 0x281   :  { %420 = shalt.err (!%p417_p0)
}
 0x282   :  { %304 = dma.vmem_to_hbm [thread:$0]  %s302_s1, 128, %s475_s2, [#allocation4]  }
 0x283   :  { %433 = dma.done.wait [#allocation4], 128  }
 0x284   :  { %434 = vsyncadd [#allocation4], 4294967168 }
 0x285   :  { %308 = vsyncpa [#allocation3], 1 }
 0x286   :  { %309 = vsyncpa [#allocation6], 1 }
 0x287   :  { %310 = vsyncpa [#allocation4], 1 }

</bundles_post_ra>
